<compile_context>
chip_gen: v6e
topology: v6e:2x2x1
jax: 0.10.0
libtpu: 0.0.40
codegen_flags: <defaults>
</compile_context>

<pallas_src>
import jax
import jax.numpy as jnp
from jax.experimental import pallas as pl
from jax.experimental.pallas import tpu as pltpu


def _round_up(n: int, m: int) -> int:
    return ((n + m - 1) // m) * m


def _softplus(x):
    # Stable form of log(exp(x) + 1): never overflows, matches module semantics.
    return jnp.maximum(x, 0.0) + jnp.log1p(jnp.exp(-jnp.abs(x)))


def _mlp_kernel(x_ref, *refs):
    """Fused MLP on one (TB, in_dim) batch tile.

    refs = (w0, b0, w1, b1, ..., w_{L-1}, b_{L-1}, out_ref); everything lives in
    VMEM.  Hidden-layer widths are lane-padded to 128 with zero weight rows/cols
    so padded lanes never contribute to real outputs.
    """
    o_ref = refs[-1]
    wb_refs = refs[:-1]
    n_layers = len(wb_refs) // 2

    h = _softplus(x_ref[...].astype(jnp.float32))
    for j in range(n_layers):
        w = wb_refs[2 * j][...]               # (din_p, dout_p) f32
        b = wb_refs[2 * j + 1][...]           # (1, dout_p), broadcasts over rows
        h = jnp.dot(h, w, preferred_element_type=jnp.float32) + b
        if j != n_layers - 1:
            h = _softplus(h)
    o_ref[...] = h.astype(o_ref.dtype)


class NetPallas:
    """JAX/Pallas port of the PyTorch Net module (single fused, jitted kernel)."""

    def __init__(self, num_hidden, hidden_dim, output_dim, key, *, batch_tile=1024):
        assert len(hidden_dim) == num_hidden
        self.num_hidden = num_hidden
        self.input_dim = hidden_dim[0]
        self.output_dim = output_dim
        self.batch_tile = batch_tile

        dims_in = list(hidden_dim)
        dims_out = list(hidden_dim[1:]) + [output_dim]
        n_layers = len(dims_in)

        self.params = []          # unpadded (W (in,out), b (out,)) — reference
        self.padded_params = []   # kernel weights: hidden dims padded to 128
        for idx, (din, dout) in enumerate(zip(dims_in, dims_out)):
            kw, kb, key = jax.random.split(key, 3)
            # Deterministic init mimicking nn.Linear's uniform(-1/sqrt(in), 1/sqrt(in)).
            bound = 1.0 / (float(din) ** 0.5)
            w = jax.random.uniform(kw, (din, dout), jnp.float32, -bound, bound)
            b = jax.random.uniform(kb, (dout,), jnp.float32, -bound, bound)
            self.params.append((w, b))

            # First layer keeps its real row count (input is not lane-padded);
            # last layer keeps its real column count (output is not lane-padded).
            din_p = din if idx == 0 else _round_up(din, 128)
            dout_p = dout if idx == n_layers - 1 else _round_up(dout, 128)
            w_p = jnp.zeros((din_p, dout_p), jnp.float32).at[:din, :dout].set(w)
            b_p = jnp.zeros((1, dout_p), jnp.float32).at[0, :dout].set(b)
            self.padded_params.append((w_p, b_p))

        # Fuse pad -> pallas_call -> slice into one executable.
        self._forward = jax.jit(self._forward_impl)

    def _forward_impl(self, x):
        B, din = x.shape
        dout = self.output_dim

        # Batch-tile selection: >= 2 grid steps for large B (keeps both v7x TCs
        # busy), padding waste bounded to <= 7 rows per tile.
        tb = min(self.batch_tile, _round_up(pl.cdiv(B, 2), 8))
        grid = pl.cdiv(B, tb)
        tb = _round_up(pl.cdiv(B, grid), 8)
        b_pad = grid * tb

        # Only batch-pad; padded rows compute garbage that is sliced off below.
        x_p = x if b_pad == B else jnp.zeros((b_pad, din), jnp.float32).at[:B].set(x)

        in_specs = [pl.BlockSpec((tb, din), lambda i: (i, 0))]
        flat_wb = []
        for w_p, bias_p in self.padded_params:
            # Constant index_map => weights/biases stay VMEM-resident across the grid.
            in_specs.append(pl.BlockSpec(w_p.shape, lambda i: (0, 0)))
            in_specs.append(pl.BlockSpec(bias_p.shape, lambda i: (0, 0)))
            flat_wb.extend((w_p, bias_p))

        flops = 2 * b_pad * sum(w.shape[0] * w.shape[1] for w, _ in self.padded_params)
        transcendentals = b_pad * (din + sum(w.shape[1] for w, _ in self.padded_params[:-1]))
        bytes_accessed = (b_pad * (din + dout) * 4
                          + 4 * sum(w.size + bb.size for w, bb in self.padded_params))

        out = pl.pallas_call(
            _mlp_kernel,
            out_shape=jax.ShapeDtypeStruct((b_pad, dout), jnp.float32),
            grid_spec=pltpu.PrefetchScalarGridSpec(
                num_scalar_prefetch=0,
                grid=(grid,),
                in_specs=in_specs,
                out_specs=pl.BlockSpec((tb, dout), lambda i: (i, 0)),
            ),
            compiler_params=pltpu.CompilerParams(
                dimension_semantics=("parallel",),   # shard batch across TCs (v7x)
                vmem_limit_bytes=32 * 1024 * 1024,   # portable budget (v5e/v6e/v7x)
            ),
            cost_estimate=pl.CostEstimate(
                flops=int(flops),
                transcendentals=int(transcendentals),
                bytes_accessed=int(bytes_accessed),
            ),
        )(x_p, *flat_wb)

        return out[:B]

    def __call__(self, x):
        x = jnp.asarray(x, jnp.float32)
        assert x.shape[1] == self.input_dim, (x.shape[1], self.input_dim)
        return self._forward(x)


def _reference_forward(net, x):
    """Pure-JAX reference matching the PyTorch forward for validation."""
    h = _softplus(x.astype(jnp.float32))
    for i, (w, b) in enumerate(net.params):
        h = h @ w + b
        if i != len(net.params) - 1:
            h = _softplus(h)
    return h


if __name__ == "__main__":
    key = jax.random.PRNGKey(0)
    k_x1, k_x2, k_p = jax.random.split(key, 3)

    # Shapes consistent with the module: num_hidden=3 layers of hidden widths
    # [32, 64, 32], output_dim=8. Input dim = hidden_dim[0] = 32.
    num_hidden = 3
    hidden_dim = [32, 64, 32]
    output_dim = 8

    net = NetPallas(num_hidden, hidden_dim, output_dim, k_p)

    ok = True
    for kx, batch in ((k_x1, 8), (k_x2, 37)):   # 37 exercises batch padding + row slicing
        x = jax.random.normal(kx, (batch, hidden_dim[0]), jnp.float32)
        out = jax.block_until_ready(net(x))
        ref = _reference_forward(net, x)
        assert out.shape == (batch, output_dim), out.shape
        ok &= bool(jnp.allclose(out, ref, atol=1e-4, rtol=1e-4))

    assert ok, "mismatch vs reference"
    print("KERNEL_OK")
</pallas_src>

<mosaic_0001>
module attributes {stable_mosaic.version = 11 : i64} {
  func.func @_mlp_kernel(%arg0: i32, %arg1: memref<8x32xf32, #tpu.memory_space<vmem>>, %arg2: memref<32x128xf32, #tpu.memory_space<vmem>>, %arg3: memref<1x128xf32, #tpu.memory_space<vmem>>, %arg4: memref<128x128xf32, #tpu.memory_space<vmem>>, %arg5: memref<1x128xf32, #tpu.memory_space<vmem>>, %arg6: memref<128x8xf32, #tpu.memory_space<vmem>>, %arg7: memref<1x8xf32, #tpu.memory_space<vmem>>, %arg8: memref<8x8xf32, #tpu.memory_space<vmem>>) attributes {dimension_semantics = [#tpu.dimension_semantics<parallel>], iteration_bounds = array<i64: 1>, scalar_prefetch = 0 : i64, scratch_operands = 0 : i64, tpu.core_type = #tpu.core_type<tc>, window_params = [{transform_indices = @transform_0, window_bounds = array<i64: 8, 32>}, {pipeline_mode = #tpu.pipeline_mode<synchronous>, transform_indices = @transform_1, window_bounds = array<i64: 32, 128>}, {pipeline_mode = #tpu.pipeline_mode<synchronous>, transform_indices = @transform_2, window_bounds = array<i64: 1, 128>}, {pipeline_mode = #tpu.pipeline_mode<synchronous>, transform_indices = @transform_3, window_bounds = array<i64: 128, 128>}, {pipeline_mode = #tpu.pipeline_mode<synchronous>, transform_indices = @transform_4, window_bounds = array<i64: 1, 128>}, {pipeline_mode = #tpu.pipeline_mode<synchronous>, transform_indices = @transform_5, window_bounds = array<i64: 128, 8>}, {pipeline_mode = #tpu.pipeline_mode<synchronous>, transform_indices = @transform_6, window_bounds = array<i64: 1, 8>}, {transform_indices = @transform_7, window_bounds = array<i64: 8, 8>}]} {
    %c0 = arith.constant 0 : index
    %c0_0 = arith.constant 0 : index
    %0 = vector.load %arg1[%c0, %c0_0] : memref<8x32xf32, #tpu.memory_space<vmem>>, vector<8x32xf32>
    %cst = arith.constant 0.000000e+00 : f32
    %1 = vector.broadcast %cst : f32 to vector<8x32xf32>
    %2 = arith.maximumf %0, %1 : vector<8x32xf32>
    %3 = math.absf %0 : vector<8x32xf32>
    %cst_1 = arith.constant 0.000000e+00 : f32
    %4 = vector.broadcast %cst_1 : f32 to vector<8x32xf32>
    %5 = arith.subf %4, %3 : vector<8x32xf32>
    %6 = math.exp %5 : vector<8x32xf32>
    %7 = math.log1p %6 : vector<8x32xf32>
    %8 = arith.addf %2, %7 : vector<8x32xf32>
    %c0_2 = arith.constant 0 : index
    %c0_3 = arith.constant 0 : index
    %9 = vector.load %arg2[%c0_2, %c0_3] : memref<32x128xf32, #tpu.memory_space<vmem>>, vector<32x128xf32>
    %c0_4 = arith.constant 0 : index
    %c0_5 = arith.constant 0 : index
    %10 = vector.load %arg3[%c0_4, %c0_5] : memref<1x128xf32, #tpu.memory_space<vmem>>, vector<1x128xf32>
    %cst_6 = arith.constant dense<0.000000e+00> : vector<8x128xf32>
    %11 = tpu.matmul %8, %9, %cst_6 {dimension_numbers = #tpu.dot_dimension_numbers<[1], [0], [0], [1], [0, 0, 1, 1], [], []>} : vector<8x32xf32>, vector<32x128xf32>, vector<8x128xf32> -> vector<8x128xf32>
    %12 = vector.broadcast %10 : vector<1x128xf32> to vector<8x128xf32>
    %13 = arith.addf %11, %12 : vector<8x128xf32>
    %cst_7 = arith.constant 0.000000e+00 : f32
    %14 = vector.broadcast %cst_7 : f32 to vector<8x128xf32>
    %15 = arith.maximumf %13, %14 : vector<8x128xf32>
    %16 = math.absf %13 : vector<8x128xf32>
    %cst_8 = arith.constant 0.000000e+00 : f32
    %17 = vector.broadcast %cst_8 : f32 to vector<8x128xf32>
    %18 = arith.subf %17, %16 : vector<8x128xf32>
    %19 = math.exp %18 : vector<8x128xf32>
    %20 = math.log1p %19 : vector<8x128xf32>
    %21 = arith.addf %15, %20 : vector<8x128xf32>
    %c0_9 = arith.constant 0 : index
    %c0_10 = arith.constant 0 : index
    %22 = vector.load %arg4[%c0_9, %c0_10] : memref<128x128xf32, #tpu.memory_space<vmem>>, vector<128x128xf32>
    %c0_11 = arith.constant 0 : index
    %c0_12 = arith.constant 0 : index
    %23 = vector.load %arg5[%c0_11, %c0_12] : memref<1x128xf32, #tpu.memory_space<vmem>>, vector<1x128xf32>
    %cst_13 = arith.constant dense<0.000000e+00> : vector<8x128xf32>
    %24 = tpu.matmul %21, %22, %cst_13 {dimension_numbers = #tpu.dot_dimension_numbers<[1], [0], [0], [1], [0, 0, 1, 1], [], []>} : vector<8x128xf32>, vector<128x128xf32>, vector<8x128xf32> -> vector<8x128xf32>
    %25 = vector.broadcast %23 : vector<1x128xf32> to vector<8x128xf32>
    %26 = arith.addf %24, %25 : vector<8x128xf32>
    %cst_14 = arith.constant 0.000000e+00 : f32
    %27 = vector.broadcast %cst_14 : f32 to vector<8x128xf32>
    %28 = arith.maximumf %26, %27 : vector<8x128xf32>
    %29 = math.absf %26 : vector<8x128xf32>
    %cst_15 = arith.constant 0.000000e+00 : f32
    %30 = vector.broadcast %cst_15 : f32 to vector<8x128xf32>
    %31 = arith.subf %30, %29 : vector<8x128xf32>
    %32 = math.exp %31 : vector<8x128xf32>
    %33 = math.log1p %32 : vector<8x128xf32>
    %34 = arith.addf %28, %33 : vector<8x128xf32>
    %c0_16 = arith.constant 0 : index
    %c0_17 = arith.constant 0 : index
    %35 = vector.load %arg6[%c0_16, %c0_17] : memref<128x8xf32, #tpu.memory_space<vmem>>, vector<128x8xf32>
    %c0_18 = arith.constant 0 : index
    %c0_19 = arith.constant 0 : index
    %36 = vector.load %arg7[%c0_18, %c0_19] : memref<1x8xf32, #tpu.memory_space<vmem>>, vector<1x8xf32>
    %cst_20 = arith.constant dense<0.000000e+00> : vector<8x8xf32>
    %37 = tpu.matmul %34, %35, %cst_20 {dimension_numbers = #tpu.dot_dimension_numbers<[1], [0], [0], [1], [0, 0, 1, 1], [], []>} : vector<8x128xf32>, vector<128x8xf32>, vector<8x8xf32> -> vector<8x8xf32>
    %38 = vector.broadcast %36 : vector<1x8xf32> to vector<8x8xf32>
    %39 = arith.addf %37, %38 : vector<8x8xf32>
    %c0_21 = arith.constant 0 : index
    %c0_22 = arith.constant 0 : index
    %40 = vector.load %arg8[%c0_21, %c0_22] : memref<8x8xf32, #tpu.memory_space<vmem>>, vector<8x8xf32>
    tpu.vector_store %arg8[%c0_21, %c0_22], %39 {strides = array<i32>} : memref<8x8xf32, #tpu.memory_space<vmem>>, vector<8x8xf32>,
    return
  }
  func.func @transform_0(%arg0: i32) -> (i32, i32) {
    %c0_i32 = arith.constant 0 : i32
    %c0_i32_0 = arith.constant 0 : i32
    return %arg0, %c0_i32 : i32, i32
  }
  func.func @transform_1(%arg0: i32) -> (i32, i32) {
    %c0_i32 = arith.constant 0 : i32
    %c0_i32_0 = arith.constant 0 : i32
    %c0_i32_1 = arith.constant 0 : i32
    return %c0_i32, %c0_i32_0 : i32, i32
  }
  func.func @transform_2(%arg0: i32) -> (i32, i32) {
    %c0_i32 = arith.constant 0 : i32
    %c0_i32_0 = arith.constant 0 : i32
    %c0_i32_1 = arith.constant 0 : i32
    return %c0_i32, %c0_i32_0 : i32, i32
  }
  func.func @transform_3(%arg0: i32) -> (i32, i32) {
    %c0_i32 = arith.constant 0 : i32
    %c0_i32_0 = arith.constant 0 : i32
    %c0_i32_1 = arith.constant 0 : i32
    return %c0_i32, %c0_i32_0 : i32, i32
  }
  func.func @transform_4(%arg0: i32) -> (i32, i32) {
    %c0_i32 = arith.constant 0 : i32
    %c0_i32_0 = arith.constant 0 : i32
    %c0_i32_1 = arith.constant 0 : i32
    return %c0_i32, %c0_i32_0 : i32, i32
  }
  func.func @transform_5(%arg0: i32) -> (i32, i32) {
    %c0_i32 = arith.constant 0 : i32
    %c0_i32_0 = arith.constant 0 : i32
    %c0_i32_1 = arith.constant 0 : i32
    return %c0_i32, %c0_i32_0 : i32, i32
  }
  func.func @transform_6(%arg0: i32) -> (i32, i32) {
    %c0_i32 = arith.constant 0 : i32
    %c0_i32_0 = arith.constant 0 : i32
    %c0_i32_1 = arith.constant 0 : i32
    return %c0_i32, %c0_i32_0 : i32, i32
  }
  func.func @transform_7(%arg0: i32) -> (i32, i32) {
    %c0_i32 = arith.constant 0 : i32
    %c0_i32_0 = arith.constant 0 : i32
    return %arg0, %c0_i32 : i32, i32
  }
}

</mosaic_0001>

<bundles_post_ra>
// kernel: _forward_impl.1
= control target key start
LH: loop header
LB: loop body
LE: loop exit
PB: predicated region body
PF: predicated region fallthrough
CT: control target
= control target key end

     0   :  { %12 = vsyncpa [#allocation3], 0  ;;  %s793_s0 = inlined_call_operand.hbm [shape: f32[8,32], index: 0, kind: input, shape index: {}]   ;;  %s794_s1 = inlined_call_operand.hbm [shape: f32[32,128], index: 1, kind: input, shape index: {}]   ;;  %s795_s2 = inlined_call_operand.vmem [shape: f32[1,128], index: 2, kind: input, shape index: {}]   ;;  %s796_s3 = inlined_call_operand.hbm [shape: f32[128,128], index: 3, kind: input, shape index: {}]   ;;  %s797_s4 = inlined_call_operand.vmem [shape: f32[1,128], index: 4, kind: input, shape index: {}]   ;;  %s798_s5 = inlined_call_operand.hbm [shape: f32[128,8], index: 5, kind: input, shape index: {}]   ;;  %s799_s6 = inlined_call_operand.vmem [shape: f32[1,8], index: 6, kind: input, shape index: {}]   ;;  %s800_s7 = inlined_call_operand.hbm [shape: f32[8,8], index: 7, kind: output, shape index: {}]  }
   0x1   :  { %13 = vsyncpa [#allocation6], 0 }
   0x2   :  { %14 = vsyncpa [#allocation9], 0 }
   0x3   :  { %15 = vsyncpa [#allocation4], 0  ;;  %s669_s24 = smov [#allocation5]  }
   0x4   :  { %s31_s25 = sshll.u32 %s669_s24, 4  ;;  %s32_s25 = int_to_ptr.vmem [resolvable:$true] %s31_s25 }
   0x5   :  { %s569_s26 = scalar_lea.vmem %s32_s25, 512  ;;  %p574_p1 = scmp.lt.s32.totalorder %s32_s25, %s32_s25 }
   0x6   :  { %p570_p0 = scmp.ne.s32.totalorder %s32_s25, %s569_s26  ;;  %p575_p2 = scmp.lt.s32.totalorder %s569_s26, %s569_s26 }
   0x8   :  { %p576_p3 = por %p575_p2, %p574_p1 }
   0xa   :  { %p577_p4 = pnand %p576_p3, %p570_p0 }
   0xc   :  { %580 = shalt.err (!%p577_p4)
}
   0xd   :  { %s670_s27 = smov 128   ;;  %s671_s28 = smov 8  }
   0xe   :  { %37 = dma.hbm_to_vmem [thread:$0]  %s794_s1, 512, %s32_s25, [#allocation6], %s670_s27, %s670_s27, %s671_s28  }
   0xf   :  { %s672_s8 = smov [#allocation2]   ;;  %s673_s10 = smov [#allocation7]  }
  0x10   :  { %s22_s9 = sshll.u32 %s672_s8, 4  ;;  %s45_s11 = sshll.u32 %s673_s10, 4  ;;  %s23_s9 = int_to_ptr.vmem [resolvable:$true] %s22_s9  ;;  %s46_s11 = int_to_ptr.vmem [resolvable:$true] %s45_s11 }
  0x11   :  { %s589_s12 = scalar_lea.vmem %s23_s9, 128  ;;  %p594_p6 = scmp.lt.s32.totalorder %s23_s9, %s23_s9 }
  0x12   :  { %p590_p5 = scmp.ne.s32.totalorder %s23_s9, %s589_s12  ;;  %p595_p7 = scmp.lt.s32.totalorder %s589_s12, %s589_s12 }
  0x14   :  { %p596_p8 = por %p595_p7, %p594_p6 }
  0x16   :  { %p597_p9 = pnand %p596_p8, %p590_p5 }
  0x18   :  { %600 = shalt.err (!%p597_p9)
}
  0x19   :  { %25 = dma.hbm_to_vmem [thread:$0]  %s793_s0, 128, %s23_s9, [#allocation3]  }
  0x1a   :  { %s609_s15 = scalar_lea.vmem %s46_s11, 2048  ;;  %p614_p11 = scmp.lt.s32.totalorder %s46_s11, %s46_s11 }
  0x1b   :  { %p610_p10 = scmp.ne.s32.totalorder %s46_s11, %s609_s15  ;;  %p615_p12 = scmp.lt.s32.totalorder %s609_s15, %s609_s15 }
  0x1d   :  { %p616_p13 = por %p615_p12, %p614_p11 }
  0x1f   :  { %p617_p0 = pnand %p616_p13, %p610_p10 }
  0x21   :  { %620 = shalt.err (!%p617_p0)
}
  0x22   :  { %51 = dma.hbm_to_vmem [thread:$0]  %s796_s3, 2048, %s46_s11, [#allocation6], %s670_s27, %s670_s27, %s671_s28  }
  0x23   :  { %s674_s17 = smov [#allocation8]  }
  0x24   :  { %s59_s18 = sshll.u32 %s674_s17, 4  ;;  %s60_s18 = int_to_ptr.vmem [resolvable:$true] %s59_s18 }
  0x25   :  { %s629_s19 = scalar_lea.vmem %s60_s18, 2048  ;;  %p634_p2 = scmp.lt.s32.totalorder %s60_s18, %s60_s18 }
  0x26   :  { %p630_p1 = scmp.ne.s32.totalorder %s60_s18, %s629_s19  ;;  %p635_p3 = scmp.lt.s32.totalorder %s629_s19, %s629_s19 }
  0x28   :  { %p636_p4 = por %p635_p3, %p634_p2 }
  0x2a   :  { %p637_p5 = pnand %p636_p4, %p630_p1 }
  0x2c   :  { %640 = shalt.err (!%p637_p5)
}
  0x2d   :  { %65 = dma.hbm_to_vmem [thread:$0]  %s798_s5, 2048, %s60_s18, [#allocation9], %s670_s27, %s670_s27, %s671_s28  }
  0x2e   :  { %661 = dma.done.wait [#allocation3], 128  }
  0x2f   :  { %662 = vsyncadd [#allocation3], 4294967168 }
  0x30   :  { %663 = dma.done.wait [#allocation6], 2560  }
  0x31   :  { %664 = vsyncadd [#allocation6], 4294964736 }
  0x32   :  { %665 = dma.done.wait [#allocation9], 2048  }
  0x33   :  { %666 = vsyncadd [#allocation9], 4294965248  ;;  %v675_v0 = vmov 0.0   ;;  %vm676_vm0 = vmmov 0   ;;  %v99_v1 = vld [vmem:[#allocation5 + $0x18] sm:$0xff]  ;;  %v98_v2 = vld [vmem:[#allocation5 + $0x10] sm:$0xff] }
  0x34   :  { %459 = vmatprep.subr.mxu0 %v675_v0  ;;  %467 = vmatprep.mubr.msk.f32.mxu0 %vm676_vm0, %v675_v0  ;;  %v80_v3 = vld [vmem:[#allocation2] sm:$0xff]  ;;  %v97_v4 = vld [vmem:[#allocation5 + $0x8] sm:$0xff]  ;;  %v96_v6 = vld [vmem:[#allocation5] sm:$0xff]  ;;  %vm107_vm2 = vcmask 261120   ;;  %s677_s23 = smov [#allocation10]   ;;  %vm397_vm5 = vcmask 64512  }
  0x35   :  { %470 = vmatprep.subr.mxu1 %v675_v0  ;;  %502 = vmatprep.mubr.msk.f32.mxu1 %vm676_vm0, %v675_v0  ;;  %v82_v5 = vand.u32 2147483647, %v80_v3  ;;  %v81_v16 = vmax.f32 %v80_v3, 0.0  ;;  %v211_v20 = vld [vmem:[#allocation7 + $0x78] sm:$0xff]  ;;  %v210_v21 = vld [vmem:[#allocation7 + $0x70] sm:$0xff]  ;;  %v209_v22 = vld [vmem:[#allocation7 + $0x68] sm:$0xff] }
  0x36   :  { %460 = vmatpush3.msra.mxu0 %v99_v1  ;;  %471 = vmatpush3.msra.mxu1 %v211_v20  ;;  %v208_v23 = vld [vmem:[#allocation7 + $0x60] sm:$0xff]  ;;  %v207_v24 = vld [vmem:[#allocation7 + $0x58] sm:$0xff]  ;;  %v206_v25 = vld [vmem:[#allocation7 + $0x50] sm:$0xff]  ;;  %s405_s24 = sshll.u32 %s677_s23, 4  ;;  %s406_s24 = int_to_ptr.vmem [resolvable:$true] %s405_s24 }
  0x37   :  { %461 = vmatprep.subr.mxu0 %v675_v0  ;;  %v83_v7 = vsub.f32 0.0, %v82_v5  ;;  %472 = vmatprep.subr.mxu1 %v675_v0  ;;  %v205_v26 = vld [vmem:[#allocation7 + $0x48] sm:$0xff]  ;;  %v204_v27 = vld [vmem:[#allocation7 + $0x40] sm:$0xff]  ;;  %v203_v28 = vld [vmem:[#allocation7 + $0x38] sm:$0xff]  ;;  %s641_s25 = scalar_lea.vmem %s406_s24, 128  ;;  %p646_p7 = scmp.lt.s32.totalorder %s406_s24, %s406_s24 }
  0x38   :  { %462 = vmatpush3.msra.mxu0 %v98_v2  ;;  %473 = vmatpush3.msra.mxu1 %v210_v21  ;;  %v202_v29 = vld [vmem:[#allocation7 + $0x30] sm:$0xff]  ;;  %v201_v30 = vld [vmem:[#allocation7 + $0x28] sm:$0xff]  ;;  %v200_v31 = vld [vmem:[#allocation7 + $0x20] sm:$0xff]  ;;  %p642_p6 = scmp.ne.s32.totalorder %s406_s24, %s641_s25  ;;  %p647_p8 = scmp.lt.s32.totalorder %s641_s25, %s641_s25 }
  0x39   :  { %463 = vmatprep.subr.mxu0 %v675_v0  ;;  %v84_v8 = vmul.f32 1.442695, %v83_v7  ;;  %474 = vmatprep.subr.mxu1 %v675_v0  ;;  %v199_v32 = vld [vmem:[#allocation7 + $0x18] sm:$0xff]  ;;  %v198_v33 = vld [vmem:[#allocation7 + $0x10] sm:$0xff]  ;;  %v197_v34 = vld [vmem:[#allocation7 + $0x8] sm:$0xff] }
  0x3a   :  { %464 = vmatpush3.msra.mxu0 %v97_v4  ;;  %475 = vmatpush3.msra.mxu1 %v209_v22  ;;  %v196_v35 = vld [vmem:[#allocation7] sm:$0xff]  ;;  %v416_v36 = vld [vmem:[%s795_s2] ss:$0 sm:$0xff]  ;;  %v318_v55 = vld [vmem:[#allocation8 + $0x70] sm:$0xff]  ;;  %p648_p9 = por %p647_p8, %p646_p7 }
  0x3b   :  { %465 = vmatprep.subr.mxu0 %v675_v0  ;;  %549 = vpow2.f32 %v84_v8  ;;  %476 = vmatprep.subr.mxu1 %v675_v0  ;;  %v319_v54 = vld [vmem:[#allocation8 + $0x78] sm:$0xff]  ;;  %v317_v56 = vld [vmem:[#allocation8 + $0x68] sm:$0xff]  ;;  %v316_v57 = vld [vmem:[#allocation8 + $0x60] sm:$0xff] }
  0x3c   :  { %466 = vmatpush3.msra.mxu0 %v96_v6  ;;  %477 = vmatpush3.msra.mxu1 %v208_v23  ;;  %v315_v58 = vld [vmem:[#allocation8 + $0x58] sm:$0xff]  ;;  %v314_v59 = vld [vmem:[#allocation8 + $0x50] sm:$0xff]  ;;  %v313_v60 = vld [vmem:[#allocation8 + $0x48] sm:$0xff]  ;;  %p649_p10 = pnand %p648_p9, %p642_p6 }
  0x3d   :  { %505 = vmatprep.subr.mxu0 %v675_v0  ;;  %478 = vmatprep.subr.mxu1 %v675_v0  ;;  %v312_v61 = vld [vmem:[#allocation8 + $0x40] sm:$0xff]  ;;  %v311_v62 = vld [vmem:[#allocation8 + $0x38] sm:$0xff]  ;;  %v310_v63 = vld [vmem:[#allocation8 + $0x30] sm:$0xff] }
  0x3e   :  { %479 = vmatpush3.msra.mxu1 %v207_v24  ;;  %v309_v1 = vld [vmem:[#allocation8 + $0x28] sm:$0xff]  ;;  %v308_v2 = vld [vmem:[#allocation8 + $0x20] sm:$0xff]  ;;  %v307_v3 = vld [vmem:[#allocation8 + $0x18] sm:$0xff] }
  0x3f   :  { %480 = vmatprep.subr.mxu1 %v675_v0  ;;  %v306_v4 = vld [vmem:[#allocation8 + $0x10] sm:$0xff]  ;;  %v305_v5 = vld [vmem:[#allocation8 + $0x8] sm:$0xff]  ;;  %v304_v6 = vld [vmem:[#allocation8] sm:$0xff] }
  0x40   :  { %481 = vmatpush3.msra.mxu1 %v206_v25  ;;  %v418_v7 = vld [vmem:[%s797_s4] ss:$0 sm:$0xff] }
  0x41   :  { %482 = vmatprep.subr.mxu1 %v675_v0  ;;  %v419_v24 = vld [vmem:[%s799_s6] ss:$0 sm:$0xff] }
  0x42   :  { %483 = vmatpush3.msra.mxu1 %v205_v26 }
  0x43   :  { %484 = vmatprep.subr.mxu1 %v675_v0 }
  0x44   :  { %485 = vmatpush3.msra.mxu1 %v204_v27 }
  0x45   :  { %486 = vmatprep.subr.mxu1 %v675_v0 }
  0x46   :  { %487 = vmatpush3.msra.mxu1 %v203_v28 }
  0x47   :  { %488 = vmatprep.subr.mxu1 %v675_v0 }
  0x48   :  { %v550_v9 = vpop.eup %549  ;;  %489 = vmatpush3.msra.mxu1 %v202_v29 }
  0x49   :  { %v86_v10 = vadd.f32 1.0, %v550_v9  ;;  %v89_v11 = vmul.f32 -0.5, %v550_v9  ;;  %v92_v13 = vand.u32 2147483647, %v550_v9  ;;  %490 = vmatprep.subr.mxu1 %v675_v0 }
  0x4a   :  { %491 = vmatpush3.msra.mxu1 %v201_v30 }
  0x4b   :  { %551 = vlog2.f32 %v86_v10  ;;  %v90_v12 = vadd.f32 1.0, %v89_v11  ;;  %vm93_vm1 = vcmp.lt.f32.partialorder %v92_v13, 0.0004427343  ;;  %492 = vmatprep.subr.mxu1 %v675_v0 }
  0x4c   :  { %493 = vmatpush3.msra.mxu1 %v200_v31 }
  0x4d   :  { %v91_v14 = vmul.f32 %v550_v9, %v90_v12  ;;  %494 = vmatprep.subr.mxu1 %v675_v0 }
  0x4e   :  { %495 = vmatpush3.msra.mxu1 %v199_v32 }
  0x4f   :  { %496 = vmatprep.subr.mxu1 %v675_v0 }
  0x50   :  { %497 = vmatpush3.msra.mxu1 %v198_v33 }
  0x51   :  { %498 = vmatprep.subr.mxu1 %v675_v0 }
  0x52   :  { %499 = vmatpush3.msra.mxu1 %v197_v34 }
  0x53   :  { %500 = vmatprep.subr.mxu1 %v675_v0 }
  0x54   :  { %501 = vmatpush3.msra.mxu1 %v196_v35 }
  0x58   :  { %v552_v15 = vpop.eup %551 }
  0x59   :  { %v88_v17 = vmul.f32 0.6931472, %v552_v15 }
  0x5b   :  { %v94_v18 = vsel %vm93_vm1, %v91_v14, %v88_v17 }
  0x5c   :  { %v95_v19 = vadd.f32 %v94_v18, %v81_v16 }
  0x5e   :  { %468 = vmatmul.mubr.msk.f32.vlgmr.msra.gmra.mxu0 %vm107_vm2, %v95_v19 }
  0x5f   :  { %537 = vmatprep.mubr.msk.f32.mxu0 %vm676_vm0, %v675_v0  ;;  %506 = vmatpush3.msra.mxu0 %v319_v54 }
  0x60   :  { %507 = vmatprep.subr.mxu0 %v675_v0 }
  0x61   :  { %508 = vmatpush3.msra.mxu0 %v318_v55 }
  0x62   :  { %509 = vmatprep.subr.mxu0 %v675_v0 }
  0x63   :  { %510 = vmatpush3.msra.mxu0 %v317_v56 }
  0x64   :  { %511 = vmatprep.subr.mxu0 %v675_v0 }
  0x65   :  { %512 = vmatpush3.msra.mxu0 %v316_v57 }
  0x66   :  { %513 = vmatprep.subr.mxu0 %v675_v0 }
  0x67   :  { %514 = vmatpush3.msra.mxu0 %v315_v58 }
  0x68   :  { %515 = vmatprep.subr.mxu0 %v675_v0 }
  0x69   :  { %516 = vmatpush3.msra.mxu0 %v314_v59 }
  0x6a   :  { %517 = vmatprep.subr.mxu0 %v675_v0 }
  0x6b   :  { %518 = vmatpush3.msra.mxu0 %v313_v60 }
  0x6c   :  { %519 = vmatprep.subr.mxu0 %v675_v0 }
  0x6d   :  { %520 = vmatpush3.msra.mxu0 %v312_v61 }
  0x6e   :  { %521 = vmatprep.subr.mxu0 %v675_v0 }
  0x6f   :  { %522 = vmatpush3.msra.mxu0 %v311_v62 }
  0x70   :  { %523 = vmatprep.subr.mxu0 %v675_v0 }
  0x71   :  { %524 = vmatpush3.msra.mxu0 %v310_v63 }
  0x72   :  { %525 = vmatprep.subr.mxu0 %v675_v0 }
  0x73   :  { %526 = vmatpush3.msra.mxu0 %v309_v1 }
  0x74   :  { %527 = vmatprep.subr.mxu0 %v675_v0 }
  0x75   :  { %528 = vmatpush3.msra.mxu0 %v308_v2 }
  0x76   :  { %529 = vmatprep.subr.mxu0 %v675_v0 }
  0x77   :  { %530 = vmatpush3.msra.mxu0 %v307_v3 }
  0x78   :  { %531 = vmatprep.subr.mxu0 %v675_v0 }
  0x79   :  { %532 = vmatpush3.msra.mxu0 %v306_v4 }
  0x7a   :  { %533 = vmatprep.subr.mxu0 %v675_v0 }
  0x7b   :  { %534 = vmatpush3.msra.mxu0 %v305_v5 }
  0x7c   :  { %535 = vmatprep.subr.mxu0 %v675_v0 }
  0x7d   :  { %536 = vmatpush3.msra.mxu0 %v304_v6 }
 0x11e   :  { %v177_v37 = vpop.f32.mrf.mxu0 }
 0x11f   :  { %v178_v38 = vadd.f32 %v416_v36, %v177_v37 }
 0x120   :  { %v469_v39 = vpop.f32.mrf.mxu0 }
 0x121   :  { %v182_v40 = vand.u32 2147483647, %v178_v38  ;;  %v181_v51 = vmax.f32 %v178_v38, 0.0 }
 0x123   :  { %v183_v41 = vsub.f32 0.0, %v182_v40 }
 0x125   :  { %v184_v42 = vmul.f32 1.442695, %v183_v41 }
 0x127   :  { %553 = vpow2.f32 %v184_v42 }
 0x134   :  { %v554_v43 = vpop.eup %553 }
 0x135   :  { %v186_v44 = vadd.f32 1.0, %v554_v43  ;;  %v189_v45 = vmul.f32 -0.5, %v554_v43  ;;  %v192_v47 = vand.u32 2147483647, %v554_v43 }
 0x137   :  { %555 = vlog2.f32 %v186_v44  ;;  %v190_v46 = vadd.f32 1.0, %v189_v45  ;;  %vm193_vm3 = vcmp.lt.f32.partialorder %v192_v47, 0.0004427343 }
 0x139   :  { %v191_v50 = vmul.f32 %v554_v43, %v190_v46 }
 0x144   :  { %v556_v48 = vpop.eup %555 }
 0x145   :  { %v188_v49 = vmul.f32 0.6931472, %v556_v48 }
 0x147   :  { %v194_v52 = vsel %vm193_vm3, %v191_v50, %v188_v49 }
 0x148   :  { %v195_v53 = vadd.f32 %v194_v52, %v181_v51 }
 0x14a   :  { %503 = vmatmul.mubr.f32.vlgmr.msra.gmra.mxu1 %v195_v53 }
 0x20a   :  { %v285_v8 = vpop.f32.mrf.mxu1 }
 0x20b   :  { %v286_v9 = vadd.f32 %v418_v7, %v285_v8 }
 0x20c   :  { %v504_v10 = vpop.f32.mrf.mxu1 }
 0x20d   :  { %v290_v11 = vand.u32 2147483647, %v286_v9  ;;  %v289_v21 = vmax.f32 %v286_v9, 0.0 }
 0x20f   :  { %v291_v12 = vsub.f32 0.0, %v290_v11 }
 0x211   :  { %v292_v13 = vmul.f32 1.442695, %v291_v12 }
 0x213   :  { %557 = vpow2.f32 %v292_v13 }
 0x220   :  { %v558_v14 = vpop.eup %557 }
 0x221   :  { %v294_v15 = vadd.f32 1.0, %v558_v14  ;;  %v297_v16 = vmul.f32 -0.5, %v558_v14  ;;  %v300_v18 = vand.u32 2147483647, %v558_v14 }
 0x223   :  { %559 = vlog2.f32 %v294_v15  ;;  %v298_v17 = vadd.f32 1.0, %v297_v16  ;;  %vm301_vm4 = vcmp.lt.f32.partialorder %v300_v18, 0.0004427343 }
 0x225   :  { %v299_v20 = vmul.f32 %v558_v14, %v298_v17 }
 0x230   :  { %v560_v0 = vpop.eup %559 }
 0x231   :  { %v296_v19 = vmul.f32 0.6931472, %v560_v0 }
 0x233   :  { %v302_v22 = vsel %vm301_vm4, %v299_v20, %v296_v19 }
 0x234   :  { %v303_v23 = vadd.f32 %v302_v22, %v289_v21 }
 0x236   :  { %538 = vmatmul.mubr.f32.vlgmr.msra.gmra.mxu0 %v303_v23 }
 0x2f6   :  { %v393_v25 = vpop.f32.mrf.mxu0 }
 0x2f7   :  { %v394_v26 = vadd.f32 %v419_v24, %v393_v25 }
 0x2f8   :  { %v539_v27 = vpop.f32.mrf.mxu0 }
 0x2f9   :  { %398 = vst.msk [vmem:[#allocation10] sm:$0xff] %vm397_vm5, %v394_v26 }
 0x2fa   :  { %652 = shalt.err (!%p649_p10)
}
 0x2fb   :  { %408 = dma.vmem_to_hbm [thread:$0]  %s406_s24, 128, %s800_s7, [#allocation4]  }
 0x2fc   :  { %667 = dma.done.wait [#allocation4], 128  }
 0x2fd   :  { %668 = vsyncadd [#allocation4], 4294967168 }
 0x2fe   :  { %412 = vsyncpa [#allocation3], 1 }
 0x2ff   :  { %413 = vsyncpa [#allocation6], 1 }
 0x300   :  { %414 = vsyncpa [#allocation9], 1 }
 0x301   :  { %415 = vsyncpa [#allocation4], 1 }

</bundles_post_ra>
